<compile_context>
chip_gen: v5e
topology: v5e:2x2
jax: 0.10.0
libtpu: 0.0.40
codegen_flags: <defaults>
</compile_context>

<pallas_src>
import functools

import jax
import jax.numpy as jnp
from jax.experimental import pallas as pl
from jax.experimental.pallas import tpu as pltpu


def _round_up(x, m):
    return ((x + m - 1) // m) * m


def _ffn_kernel(x_ref, w1t_ref, b1_ref, w2t_ref, b2_ref, out_ref, *, n_chunks, tp):
    """One row-tile of the FFN.  All matmul accumulation is f32 on the MXU."""
    x = x_ref[...]                                        # (TM, H) in compute dtype
    tm = x.shape[0]
    h_out = out_ref.shape[-1]

    acc = jnp.zeros((tm, h_out), jnp.float32)
    for c in range(n_chunks):                             # static, unrolled (small)
        lo = c * tp
        # fc_1 chunk:  x @ W1.T[:, lo:lo+tp] + b1[lo:lo+tp]   (f32 accumulate)
        h = jnp.dot(x, w1t_ref[:, lo:lo + tp],
                    preferred_element_type=jnp.float32)
        h = jnp.maximum(h + b1_ref[:, lo:lo + tp], 0.0)    # bias + ReLU in f32
        # fc_2 chunk: consume the intermediate immediately, accumulate in f32.
        acc = acc + jnp.dot(h.astype(w2t_ref.dtype), w2t_ref[lo:lo + tp, :],
                            preferred_element_type=jnp.float32)

    out_ref[...] = (acc + b2_ref[...]).astype(out_ref.dtype)


def make_ffn_params(w1, b1, w2, b2, compute_dtype=jnp.float32):
    """Prepare the kernel parameter layout ONCE (hoists transposes out of the call).

    w1: (pf_dim, hid_dim), b1: (pf_dim,)   -- nn.Linear(hid_dim, pf_dim)
    w2: (hid_dim, pf_dim), b2: (hid_dim,)  -- nn.Linear(pf_dim, hid_dim)
    Returns (w1t, b1r, w2t, b2r): transposed weights in compute_dtype, f32 biases.
    """
    w1t = jnp.transpose(w1).astype(compute_dtype)          # (H, P)
    w2t = jnp.transpose(w2).astype(compute_dtype)          # (P, H)
    b1r = b1.reshape(1, -1).astype(jnp.float32)            # (1, P)
    b2r = b2.reshape(1, -1).astype(jnp.float32)            # (1, H)
    return w1t, b1r, w2t, b2r


def positionwise_ffn(x, w1t, b1r, w2t, b2r, *, tm=512, tp=None):
    """Pallas forward of PositionwiseFeedforwardLayer (eval mode).

    x:   (B, S, hid_dim)
    w1t: (hid_dim, pf_dim)  [= W1.T],  b1r: (1, pf_dim)
    w2t: (pf_dim, hid_dim)  [= W2.T],  b2r: (1, hid_dim)
    tm:  row tile (re-derive per TPU generation; 256-512 for v7x 64 MiB VMEM,
         512-1024 for v6e, 256-512 for v5e). Must be a multiple of 8.
    tp:  optional pf_dim chunk size (cap the live intermediate at TM x tp).
    """
    B, S, H = x.shape
    Hin, P = w1t.shape
    assert Hin == H and w2t.shape == (P, H)
    R = B * S
    compute_dtype = w1t.dtype

    # Flatten batch*seq into rows; cast x once to the matmul input dtype
    # (halves HBM traffic for activations on the bf16 path).
    x2d = x.reshape(R, H).astype(compute_dtype)

    # Row tile: full array if it already fits one tile, else pad R to a multiple of tm.
    if R <= tm:
        TM, Rpad = R, R
    else:
        assert tm % 8 == 0, "row tile must be a multiple of 8 (sublane granularity)"
        TM = tm
        Rpad = _round_up(R, TM)
        if Rpad != R:
            x2d = jnp.pad(x2d, ((0, Rpad - R), (0, 0)))

    # pf_dim chunking (only matters for large pf_dim).
    if tp is None or tp >= P:
        tp_eff, n_chunks = P, 1
    else:
        assert P % tp == 0, "tp must divide pf_dim"
        tp_eff, n_chunks = tp, P // tp

    grid = (Rpad // TM,)

    # Generation-aware VMEM budget: double-buffered x/out tiles, single-buffered
    # resident weights, f32 live intermediate + accumulator. Capped at 64 MiB (v7x).
    in_item = jnp.dtype(compute_dtype).itemsize
    out_item = jnp.dtype(x.dtype).itemsize
    vmem_est = (2 * TM * H * in_item               # x tiles (double-buffered)
                + 2 * TM * H * out_item            # out tiles (double-buffered)
                + 2 * H * P * in_item              # W1.T + W2.T (single-buffered)
                + (P + H) * 4                      # biases
                + TM * tp_eff * 4                  # live ReLU intermediate
                + TM * H * 4)                      # f32 accumulator
    vmem_limit = int(min(max(2 * vmem_est, 32 * 2**20), 64 * 2**20))

    resident = dict(pipeline_mode=pl.Buffered(1))  # grid-invariant: one VMEM buffer

    out2d = pl.pallas_call(
        functools.partial(_ffn_kernel, n_chunks=n_chunks, tp=tp_eff),
        out_shape=jax.ShapeDtypeStruct((Rpad, H), x.dtype),
        grid=grid,
        in_specs=[
            pl.BlockSpec((TM, H), lambda i: (i, 0)),            # x row tile
            pl.BlockSpec((H, P), lambda i: (0, 0), **resident),  # W1.T (resident)
            pl.BlockSpec((1, P), lambda i: (0, 0), **resident),  # b1   (resident)
            pl.BlockSpec((P, H), lambda i: (0, 0), **resident),  # W2.T (resident)
            pl.BlockSpec((1, H), lambda i: (0, 0), **resident),  # b2   (resident)
        ],
        out_specs=pl.BlockSpec((TM, H), lambda i: (i, 0)),
        compiler_params=pltpu.CompilerParams(
            dimension_semantics=("parallel",),       # rows independent -> 2 TCs on v7x
            vmem_limit_bytes=vmem_limit),
    )(x2d, w1t, b1r, w2t, b2r)

    if Rpad != R:
        out2d = out2d[:R]
    return out2d.reshape(B, S, H)


def ffn_reference(x, w1, b1, w2, b2):
    """Pure-JAX reference mirroring the PyTorch forward exactly (eval mode)."""
    h = jnp.maximum(x @ w1.T + b1, 0.0)
    return h @ w2.T + b2


if __name__ == "__main__":
    # Small shapes consistent with the module: batch=2, seq=8, hid_dim=32, pf_dim=128.
    # NOTE: hid_dim=32 (<128 lanes) is lane-starved on TPU; production configs should
    # use hid_dim as a multiple of 128 (the kernel itself handles any H).
    B, S, H, P = 2, 8, 32, 128

    key0 = jax.random.PRNGKey(0)
    k1, k2, k3 = jax.random.split(key0, 3)

    def lin_params(k, out_dim, in_dim):
        # deterministic, nn.Linear-shaped params: W (out, in), b (out,)
        kw, kb = jax.random.split(k)
        bound = 1.0 / (in_dim ** 0.5)
        W = jax.random.uniform(kw, (out_dim, in_dim), jnp.float32, -bound, bound)
        b = jax.random.uniform(kb, (out_dim,), jnp.float32, -bound, bound)
        return W, b

    w1, b1 = lin_params(k1, P, H)   # fc_1: hid_dim -> pf_dim
    w2, b2 = lin_params(k2, H, P)   # fc_2: pf_dim -> hid_dim
    x = jax.random.normal(k3, (B, S, H), jnp.float32)

    ref = ffn_reference(x, w1, b1, w2, b2)

    # Path 1: f32 matmuls, multi-step row grid (tm=8 -> 2 grid steps) and
    # pf_dim chunking (tp=64 -> 2 chunks) to exercise the tiled code paths.
    params_f32 = make_ffn_params(w1, b1, w2, b2, jnp.float32)
    out = positionwise_ffn(x, *params_f32, tm=8, tp=64)
    out = jax.block_until_ready(out)
    assert out.shape == (B, S, H)
    assert jnp.allclose(out, ref, atol=1e-4, rtol=1e-4)

    # Path 2: bf16 matmul inputs with f32 accumulation (v6e/v7x MXU fast path),
    # single row tile (whole problem fits), resident single-buffered weights.
    params_bf16 = make_ffn_params(w1, b1, w2, b2, jnp.bfloat16)
    out_bf16 = positionwise_ffn(x, *params_bf16)
    out_bf16 = jax.block_until_ready(out_bf16)
    assert out_bf16.shape == (B, S, H)
    assert jnp.allclose(out_bf16, ref, atol=5e-2, rtol=5e-2)

    print("KERNEL_OK")
</pallas_src>

<mosaic_0001>
module attributes {stable_mosaic.version = 11 : i64} {
  func.func @_ffn_kernel(%arg0: i32, %arg1: memref<8x32xf32, #tpu.memory_space<vmem>>, %arg2: memref<32x128xf32, #tpu.memory_space<vmem>>, %arg3: memref<1x128xf32, #tpu.memory_space<vmem>>, %arg4: memref<128x32xf32, #tpu.memory_space<vmem>>, %arg5: memref<1x32xf32, #tpu.memory_space<vmem>>, %arg6: memref<8x32xf32, #tpu.memory_space<vmem>>) attributes {dimension_semantics = [#tpu.dimension_semantics<parallel>], iteration_bounds = array<i64: 2>, scalar_prefetch = 0 : i64, scratch_operands = 0 : i64, tpu.core_type = #tpu.core_type<tc>, window_params = [{transform_indices = @transform_0, window_bounds = array<i64: 8, 32>}, {pipeline_mode = #tpu.pipeline_mode<synchronous>, transform_indices = @transform_1, window_bounds = array<i64: 32, 128>}, {pipeline_mode = #tpu.pipeline_mode<synchronous>, transform_indices = @transform_2, window_bounds = array<i64: 1, 128>}, {pipeline_mode = #tpu.pipeline_mode<synchronous>, transform_indices = @transform_3, window_bounds = array<i64: 128, 32>}, {pipeline_mode = #tpu.pipeline_mode<synchronous>, transform_indices = @transform_4, window_bounds = array<i64: 1, 32>}, {transform_indices = @transform_5, window_bounds = array<i64: 8, 32>}]} {
    %c0 = arith.constant 0 : index
    %c0_0 = arith.constant 0 : index
    %0 = vector.load %arg1[%c0, %c0_0] : memref<8x32xf32, #tpu.memory_space<vmem>>, vector<8x32xf32>
    %cst = arith.constant 0.000000e+00 : f32
    %1 = vector.broadcast %cst : f32 to vector<8x32xf32>
    %c0_1 = arith.constant 0 : index
    %c0_2 = arith.constant 0 : index
    %2 = vector.load %arg2[%c0_1, %c0_2] : memref<32x128xf32, #tpu.memory_space<vmem>>, vector<32x64xf32>
    %cst_3 = arith.constant dense<0.000000e+00> : vector<8x64xf32>
    %3 = tpu.matmul %0, %2, %cst_3 {dimension_numbers = #tpu.dot_dimension_numbers<[1], [0], [0], [1], [0, 0, 1, 1], [], []>} : vector<8x32xf32>, vector<32x64xf32>, vector<8x64xf32> -> vector<8x64xf32>
    %c0_4 = arith.constant 0 : index
    %c0_5 = arith.constant 0 : index
    %4 = vector.load %arg3[%c0_4, %c0_5] : memref<1x128xf32, #tpu.memory_space<vmem>>, vector<1x64xf32>
    %5 = vector.broadcast %4 : vector<1x64xf32> to vector<8x64xf32>
    %6 = arith.addf %3, %5 : vector<8x64xf32>
    %cst_6 = arith.constant 0.000000e+00 : f32
    %7 = vector.broadcast %cst_6 : f32 to vector<8x64xf32>
    %8 = arith.maximumf %6, %7 : vector<8x64xf32>
    %c0_7 = arith.constant 0 : index
    %c0_8 = arith.constant 0 : index
    %9 = vector.load %arg4[%c0_7, %c0_8] : memref<128x32xf32, #tpu.memory_space<vmem>>, vector<64x32xf32>
    %cst_9 = arith.constant dense<0.000000e+00> : vector<8x32xf32>
    %10 = tpu.matmul %8, %9, %cst_9 {dimension_numbers = #tpu.dot_dimension_numbers<[1], [0], [0], [1], [0, 0, 1, 1], [], []>} : vector<8x64xf32>, vector<64x32xf32>, vector<8x32xf32> -> vector<8x32xf32>
    %11 = arith.addf %1, %10 : vector<8x32xf32>
    %c0_10 = arith.constant 0 : index
    %c64 = arith.constant 64 : index
    %12 = vector.load %arg2[%c0_10, %c64] : memref<32x128xf32, #tpu.memory_space<vmem>>, vector<32x64xf32>
    %cst_11 = arith.constant dense<0.000000e+00> : vector<8x64xf32>
    %13 = tpu.matmul %0, %12, %cst_11 {dimension_numbers = #tpu.dot_dimension_numbers<[1], [0], [0], [1], [0, 0, 1, 1], [], []>} : vector<8x32xf32>, vector<32x64xf32>, vector<8x64xf32> -> vector<8x64xf32>
    %c0_12 = arith.constant 0 : index
    %c64_13 = arith.constant 64 : index
    %14 = vector.load %arg3[%c0_12, %c64_13] : memref<1x128xf32, #tpu.memory_space<vmem>>, vector<1x64xf32>
    %15 = vector.broadcast %14 : vector<1x64xf32> to vector<8x64xf32>
    %16 = arith.addf %13, %15 : vector<8x64xf32>
    %cst_14 = arith.constant 0.000000e+00 : f32
    %17 = vector.broadcast %cst_14 : f32 to vector<8x64xf32>
    %18 = arith.maximumf %16, %17 : vector<8x64xf32>
    %c64_15 = arith.constant 64 : index
    %c0_16 = arith.constant 0 : index
    %19 = vector.load %arg4[%c64_15, %c0_16] : memref<128x32xf32, #tpu.memory_space<vmem>>, vector<64x32xf32>
    %cst_17 = arith.constant dense<0.000000e+00> : vector<8x32xf32>
    %20 = tpu.matmul %18, %19, %cst_17 {dimension_numbers = #tpu.dot_dimension_numbers<[1], [0], [0], [1], [0, 0, 1, 1], [], []>} : vector<8x64xf32>, vector<64x32xf32>, vector<8x32xf32> -> vector<8x32xf32>
    %21 = arith.addf %11, %20 : vector<8x32xf32>
    %c0_18 = arith.constant 0 : index
    %c0_19 = arith.constant 0 : index
    %22 = vector.load %arg5[%c0_18, %c0_19] : memref<1x32xf32, #tpu.memory_space<vmem>>, vector<1x32xf32>
    %23 = vector.broadcast %22 : vector<1x32xf32> to vector<8x32xf32>
    %24 = arith.addf %21, %23 : vector<8x32xf32>
    %c0_20 = arith.constant 0 : index
    %c0_21 = arith.constant 0 : index
    %25 = vector.load %arg6[%c0_20, %c0_21] : memref<8x32xf32, #tpu.memory_space<vmem>>, vector<8x32xf32>
    tpu.vector_store %arg6[%c0_20, %c0_21], %24 {strides = array<i32>} : memref<8x32xf32, #tpu.memory_space<vmem>>, vector<8x32xf32>,
    return
  }
  func.func @transform_0(%arg0: i32) -> (i32, i32) {
    %c0_i32 = arith.constant 0 : i32
    %c0_i32_0 = arith.constant 0 : i32
    return %arg0, %c0_i32 : i32, i32
  }
  func.func @transform_1(%arg0: i32) -> (i32, i32) {
    %c0_i32 = arith.constant 0 : i32
    %c0_i32_0 = arith.constant 0 : i32
    %c0_i32_1 = arith.constant 0 : i32
    return %c0_i32, %c0_i32_0 : i32, i32
  }
  func.func @transform_2(%arg0: i32) -> (i32, i32) {
    %c0_i32 = arith.constant 0 : i32
    %c0_i32_0 = arith.constant 0 : i32
    %c0_i32_1 = arith.constant 0 : i32
    return %c0_i32, %c0_i32_0 : i32, i32
  }
  func.func @transform_3(%arg0: i32) -> (i32, i32) {
    %c0_i32 = arith.constant 0 : i32
    %c0_i32_0 = arith.constant 0 : i32
    %c0_i32_1 = arith.constant 0 : i32
    return %c0_i32, %c0_i32_0 : i32, i32
  }
  func.func @transform_4(%arg0: i32) -> (i32, i32) {
    %c0_i32 = arith.constant 0 : i32
    %c0_i32_0 = arith.constant 0 : i32
    %c0_i32_1 = arith.constant 0 : i32
    return %c0_i32, %c0_i32_0 : i32, i32
  }
  func.func @transform_5(%arg0: i32) -> (i32, i32) {
    %c0_i32 = arith.constant 0 : i32
    %c0_i32_0 = arith.constant 0 : i32
    return %arg0, %c0_i32 : i32, i32
  }
}

</mosaic_0001>

<bundles_post_ra>
// kernel: tpu_custom_call.1
= control target key start
LH: loop header
LB: loop body
LE: loop exit
PB: predicated region body
PF: predicated region fallthrough
CT: control target
= control target key end

     0   :  { %10 = vsyncpa [#allocation3], 0  ;;  %s753_s0 = inlined_call_operand.vmem [shape: f32[16,32], index: 0, kind: input, shape index: {}]   ;;  %s754_s1 = inlined_call_operand.vmem [shape: f32[32,128], index: 1, kind: input, shape index: {}]   ;;  %s755_s2 = inlined_call_operand.vmem [shape: f32[1,128], index: 2, kind: input, shape index: {}]   ;;  %s756_s3 = inlined_call_operand.vmem [shape: f32[128,32], index: 3, kind: input, shape index: {}]   ;;  %s757_s4 = inlined_call_operand.vmem [shape: f32[1,32], index: 4, kind: input, shape index: {}]   ;;  %s758_s5 = inlined_call_operand.hbm [shape: f32[16,32], index: 5, kind: output, shape index: {}]  }
   0x1   :  { %12 = vsyncpa [#allocation3 + $0x1], 0  ;;  %s599_s18 = smov 0   ;;  %s601_s19 = smov 0  }
   0x2   :  { %s603_s20 = smov 0   ;;  %s605_s21 = smov 0  }
   0x3 LB: > { %s620_s22 = sadd.s32 4294967295, %s566_s21   ;;  %s438_s23 = sadd.s32 4294967294, %s566_s21   ;;  %s566_s21 = sphi %s605_s21, %s764_s21   ;;  %s562_s20 = sphi %s603_s20, %s763_s20   ;;  %s558_s19 = sphi %s601_s19, %s762_s19   ;;  %s554_s18 = sphi %s599_s18, %s761_s18  }
   0x4   : > { %s624_s24 = sadd.s32 1, %s566_s21   ;;  %s135_s25 = sadd.s32 1, %s562_s20 }
   0x5   : > { %s132_s26 = ssub.s32 %s566_s21, %s624_s24  ;;  %p145_p0 = scmp.ne.s32.totalorder %s562_s20, %s558_s19 }
   0x6   : > { %p133_p1 = scmp.eq.s32.totalorder %s132_s26, 0  ;;  %p146_p2 = scmp.eq.s32.totalorder %s620_s22, 1 }
   0x7   : > { %p151_p3 = scmp.ne.s32.totalorder %s558_s19, %s554_s18  ;;  %p152_p4 = scmp.eq.s32.totalorder %s438_s23, 1 }
   0x8   : > { %s635_s27 = scalar_select %p133_p1, %s562_s20, %s135_s25  }
   0x9   : > { %p637_p5 = por %p146_p2, %p145_p0  ;;  %p641_p6 = por %p152_p4, %p151_p3 }
   0xa   : > { %p441_p7 = scmp.ge.s32.totalorder %s566_s21, 1  ;;  %p189_p8 = scmp.lt.s32.totalorder %s566_s21, 3 }
   0xc   : > { %p190_p9 = pnand %p441_p7, %p189_p8 }
   0xd   : > { %s568_s9 = smov (!%p190_p9), 64   ;;  %p216_p10 = scmp.lt.s32.totalorder (!%p190_p9), %s620_s22, 1 }
   0xe   : > { %193 = sbr.rel (%p190_p9) target bundleno = 419 (0x1a3), region = 40  ;;  %s449_s7 = sshll.u32 (!%p190_p9), %s620_s22, 3 }
   0xf   : > { %s374_s11 = scalar_lea.hbm (!%p190_p9), %s758_s5, %s449_s7  ;;  %s524_s30 = scalar_lea.hbm (!%p190_p9), %s758_s5, 16 }
  0x10   : > { %s378_s16 = sshll.u32 (!%p190_p9), %s374_s11, 4  ;;  %s379_s16 = int_to_ptr.hbm [resolvable:$true] %s378_s16 }
  0x11   : > { %s518_s17 = sshra.s32 (!%p190_p9), %s379_s16, 4  ;;  %s519_s17 = int_to_ptr.hbm [resolvable:$true] %s518_s17 }
  0x12   : > { %p525_p0 = scmp.lt.s32.totalorder (!%p190_p9), %s519_s17, %s758_s5 }
  0x13   : > { %v223_v0 = vld [vmem:[%s754_s1 + $0x10] sm:$0xff]  ;;  %v224_v1 = vld [vmem:[%s754_s1 + $0x18] sm:$0xff]  ;;  %v221_v3 = vld [vmem:[%s754_s1] sm:$0xff]  ;;  %s217_s14 = scalar_select %p216_p10, %s620_s22, 1  ;;  %vm229_vm0 = vcmask 261120   ;;  %vm310_vm1 = vcmask 523264  }
  0x14   : > { %v492_v2 = vpack.i.bf16 %v223_v0, %v224_v1  ;;  %245 = vmatpush.msra.mxu0 %v224_v1  ;;  %v222_v4 = vld [vmem:[%s754_s1 + $0x8] sm:$0xff]  ;;  %v502_v7 = vld [vmem:[%s755_s2] ss:$0 sm:$0xff]  ;;  %v309_v8 = vld [vmem:[%s756_s3 + $0x78] sm:$0xff] }
  0x15   : > { %v497_v5 = vpack.i.bf16 %v221_v3, %v222_v4  ;;  %s443_s15 = sshll.u32 %s217_s14, 3  ;;  %v261_v9 = vld [vmem:[%s756_s3 + $0x38] sm:$0xff]  ;;  %322 = vmatpush.msra.mxu2 %v309_v8  ;;  %v308_v10 = vld [vmem:[%s756_s3 + $0x70] sm:$0xff]  ;;  %278 = vrot.lane.b32.xlu1 %v502_v7, %s568_s9  ;;  %v307_v12 = vld [vmem:[%s756_s3 + $0x68] sm:$0xff] }
  0x16   : > { %493 = vrot.lane.b32.xlu0 %v492_v2, %s568_s9  ;;  %246 = vmatpush.msra.mxu0 %v223_v0  ;;  %s219_s23 = scalar_lea.vmem %s753_s0, %s443_s15  ;;  %v260_v11 = vld [vmem:[%s756_s3 + $0x30] sm:$0xff]  ;;  %v259_v13 = vld [vmem:[%s756_s3 + $0x28] sm:$0xff]  ;;  %v306_v14 = vld [vmem:[%s756_s3 + $0x60] sm:$0xff] }
  0x17   : > { %v220_v6 = vld [vmem:[%s219_s23] sm:$0xff]  ;;  %345 = vmatpush.msra.mxu3 %v261_v9  ;;  %323 = vmatpush.msra.mxu2 %v308_v10  ;;  %v305_v16 = vld [vmem:[%s756_s3 + $0x58] sm:$0xff]  ;;  %v304_v18 = vld [vmem:[%s756_s3 + $0x50] sm:$0xff]  ;;  %s520_s23 = scalar_lea.hbm %s519_s17, 8 }
  0x18   : > { %247 = vmatpush.msra.mxu0 %v222_v4  ;;  %v258_v15 = vld [vmem:[%s756_s3 + $0x20] sm:$0xff]  ;;  %v257_v17 = vld [vmem:[%s756_s3 + $0x18] sm:$0xff]  ;;  %v256_v19 = vld [vmem:[%s756_s3 + $0x10] sm:$0xff]  ;;  %p521_p11 = scmp.ne.s32.totalorder %s519_s17, %s520_s23  ;;  %p526_p1 = scmp.lt.s32.totalorder %s524_s30, %s520_s23 }
  0x19   : > { %346 = vmatpush.msra.mxu3 %v260_v11  ;;  %324 = vmatpush.msra.mxu2 %v307_v12  ;;  %v303_v28 = vld [vmem:[%s756_s3 + $0x48] sm:$0xff]  ;;  %v302_v31 = vld [vmem:[%s756_s3 + $0x40] sm:$0xff] }
  0x1a   : > { %248 = vmatpush.msra.mxu0 %v221_v3  ;;  %v255_v29 = vld [vmem:[%s756_s3 + $0x8] sm:$0xff]  ;;  %v254_v32 = vld [vmem:[%s756_s3] sm:$0xff]  ;;  %p522_p12 = pnand %p521_p11, %p637_p5  ;;  %p527_p2 = por %p526_p1, %p525_p0 }
  0x1b   : > { %444 = vmatmul.msk.f32.vlgmr.msra.gmra.mxu0 %vm229_vm0, %v220_v6  ;;  %347 = vmatpush.msra.mxu3 %v259_v13  ;;  %v503_v38 = vld [vmem:[%s757_s4] ss:$0 sm:$0xff] }
  0x1c   : > { %325 = vmatpush.msra.mxu2 %v306_v14  ;;  %p523_p13 = pneg %p522_p12 }
  0x1d   : > { %348 = vmatpush.msra.mxu3 %v258_v15 }
  0x1e   : > { %498 = vrot.lane.b32.xlu0 %v497_v5, %s568_s9  ;;  %326 = vmatpush.msra.mxu2 %v305_v16  ;;  %s213_s9 = sand.u32 1, %s558_s19   ;;  %p528_p3 = pnand %p527_p2, %p523_p13 }
  0x1f   : > { %349 = vmatpush.msra.mxu3 %v257_v17  ;;  %s442_s6 = sshll.u32 %s213_s9, 3  ;;  %s364_s22 = scalar_lea.sflag [#allocation3], %s213_s9 }
  0x20   : > { %327 = vmatpush.msra.mxu2 %v304_v18  ;;  %s215_s14 = scalar_lea.vmem [#allocation2], %s442_s6 }
  0x21   : > { %350 = vmatpush.msra.mxu3 %v256_v19  ;;  %s376_s15 = sshll.u32 %s215_s14, 4  ;;  %s377_s15 = int_to_ptr.vmem [resolvable:$true] %s376_s15 }
  0x22   : > { %328 = vmatpush.msra.mxu2 %v303_v28 }
  0x23   : > { %351 = vmatpush.msra.mxu3 %v255_v29 }
  0x24   : > { %329 = vmatpush.msra.mxu2 %v302_v31 }
  0x25   : > { %352 = vmatpush.msra.mxu3 %v254_v32 }
  0x87   : > { %v279_v33 = vpop.permute.xlu1 %278 }
  0x88   : > { %v494_v20 = vpop.permute.xlu0 %493 }
  0x89   : > { %v495_v21 = vunpack.i.l.bf16 %v494_v20  ;;  %v496_v22 = vunpack.i.h.bf16 %v494_v20 }
  0x8b   : > { %293 = vmatpush.msra.mxu1 %v495_v21 }
  0x8d   : > { %294 = vmatpush.msra.mxu1 %v496_v22 }
  0x90   : > { %v499_v23 = vpop.permute.xlu0 %498 }
  0x91   : > { %v500_v24 = vunpack.i.l.bf16 %v499_v23  ;;  %v501_v25 = vunpack.i.h.bf16 %v499_v23 }
  0x93   : > { %295 = vmatpush.msra.mxu1 %v500_v24 }
  0x95   : > { %296 = vmatpush.msra.mxu1 %v501_v25 }
  0x96   : > { %445 = vmatmul.msk.f32.vlgmr.msra.gmra.mxu1 %vm229_vm0, %v220_v6 }
  0x98   : > { %v250_v26 = vpop.f32.mrf.mxu0 }
  0x99   : > { %v251_v27 = vadd.f32 %v502_v7, %v250_v26 }
  0x9b   : > { %v253_v30 = vmax.f32 %v251_v27, 0.0 }
  0x9d   : > { %447 = vmatmul.msk.f32.vlgmr.msra.gmra.mxu3 %vm310_vm1, %v253_v30 }
 0x113   : > { %v298_v34 = vpop.f32.mrf.mxu1 }
 0x114   : > { %v299_v35 = vadd.f32 %v298_v34, %v279_v33 }
 0x116   : > { %v301_v36 = vmax.f32 %v299_v35, 0.0 }
 0x118   : > { %446 = vmatmul.msk.f32.vlgmr.msra.gmra.mxu2 %vm310_vm1, %v301_v36 }
 0x120   : > { %v354_v37 = vpop.f32.mrf.mxu3 }
 0x19b   : > { %v331_v39 = vpop.f32.mrf.mxu2 }
 0x19c   : > { %v355_v40 = vadd.f32 %v354_v37, %v331_v39 }
 0x19e   : > { %v361_v41 = vadd.f32 %v503_v38, %v355_v40 }
 0x1a0   : > { %362 = vst.msk [vmem:[%s215_s14] sm:$0xff] %vm229_vm0, %v361_v41 }
 0x1a1   : > { %531 = shalt.err (!%p528_p3)
}
 0x1a2   : > { %452 = dma.vmem_to_hbm [thread:$0]  (%p637_p5), %s377_s15, 128, %s379_s16, %s364_s22  }
 0x1a3 PF: > { %p458_p4 = scmp.ge.s32.totalorder %s566_s21, 2  ;;  %s390_s9 = sand.u32 1, %s554_s18  }
 0x1a4   : > { %s391_s8 = scalar_lea.sflag [#allocation3], %s390_s9 }
 0x1a5   : > { %p455_p7 = pnand %p458_p4, %p641_p6 }
 0x1a7   : > { %p456_p8 = pneg %p455_p7 }
 0x1a9   : > { %549 = dma.done.wait (%p456_p8), %s391_s8, 128  }
 0x1aa   : > { %551 = vsyncadd (%p456_p8), %s391_s8, 4294967168  ;;  %p15_p9 = scmp.ge.s32.totalorder %s624_s24, 4   ;;  %s761_s18 = smov %s558_s19 }
 0x1ab   : > { %s762_s19 = smov %s562_s20  ;;  %s763_s20 = smov %s635_s27 }
 0x1ac   : > { %s764_s21 = smov %s624_s24  ;;  %17 = sbr.rel (!%p15_p9) target bundleno = 3 (0x3), region = 75 }
 0x1b1   :  { %397 = vsyncpa [#allocation3], 1 }
 0x1b2   :  { %399 = vsyncpa [#allocation3 + $0x1], 1 }

</bundles_post_ra>
